<compile_context>
chip_gen: v7x
topology: tpu7x:2x2x1
jax: 0.10.0
libtpu: 0.0.40
codegen_flags: <defaults>
</compile_context>

<pallas_src>
import jax
import jax.numpy as jnp
from jax.experimental import pallas as pl
from jax.experimental.pallas import tpu as pltpu


def _gather_cols_kernel(idx_ref, x_ref, out_ref):
    """Gather columns of a (4, N) slab via one-hot matmuls on the MXU.

    idx_ref : VMEM (8, P_out) int32   flat column indices (row 0 is the real data,
                                      rows 1..7 are sublane padding)
    x_ref   : VMEM (4, R, 128) f32    per-batch match slab, lane-dense, resident
    out_ref : VMEM (4, P_out)  f32    gathered columns (lane-dense store)
    """
    R = x_ref.shape[1]
    p_out = out_ref.shape[-1]
    # lane[c, p] = c  (row index == lane-within-128-block of the source column)
    lane = jax.lax.broadcasted_iota(jnp.int32, (128, 128), 0)
    idx_all = idx_ref[0:1, :]                                    # (1, P_out) int32

    for sub in range(p_out // 128):                              # static sub-chunks
        idx = idx_all[:, sub * 128:(sub + 1) * 128]              # (1, 128)

        def one_block(blk, tile):
            # S_blk[c, p] = 1.0 iff sample p selects source column blk*128 + c.
            sel = jnp.where((idx - blk * 128) == lane, 1.0, 0.0)  # (128, 128) f32
            return jnp.dot(tile, sel, preferred_element_type=jnp.float32)

        if R <= 64:
            # Small frames: fully static loop, static slab slices, independent
            # matmuls (only cheap (4,128) adds are carried).
            acc = jnp.zeros((4, 128), jnp.float32)
            for blk in range(R):
                acc = acc + one_block(blk, x_ref[:, blk, :])
        else:
            # TODO(synk): for very large frames (R >> 128) a per-sample dynamic
            # gather is cheaper than a dense N x P selection; this fori_loop path
            # keeps correctness for big inputs.
            def body(blk, acc):
                tile = x_ref[:, pl.ds(blk, 1), :][:, 0, :]
                return acc + one_block(blk, tile)
            acc = jax.lax.fori_loop(0, R, body, jnp.zeros((4, 128), jnp.float32))

        out_ref[:, sub * 128:(sub + 1) * 128] = acc.astype(out_ref.dtype)


def _gather_columns(idx8, match4, p_out):
    """idx8: (B, 8, K_pad) int32 ; match4: (B, 4, R, 128) f32 -> (B, 4, K_pad) f32."""
    B, _, K_pad = idx8.shape
    _, C, R, L = match4.shape
    assert C == 4 and L == 128 and K_pad % p_out == 0
    G = K_pad // p_out

    slab_bytes = C * R * L * 4
    blk_bytes = (8 + C) * p_out * 4
    vmem_limit = int(min(128 * 1024 * 1024,
                         max(32 * 1024 * 1024,
                             2 * (slab_bytes + blk_bytes) + (4 << 20))))

    return pl.pallas_call(
        _gather_cols_kernel,
        out_shape=jax.ShapeDtypeStruct((B, C, K_pad), jnp.float32),
        grid=(B, G),
        in_specs=[
            # Lane-dense index chunk for this output tile (sublane-padded to 8).
            pl.BlockSpec((None, 8, p_out), lambda b, g: (b, 0, g)),
            # Whole per-batch slab resident in VMEM; block index is constant
            # across g so it is only re-DMA'd on batch change.
            # TODO(synk): for very large frames on v7x, single-buffer this slab
            # (pl.Buffered(1)) or add an R-tiling grid axis with accumulation.
            pl.BlockSpec((None, C, R, L), lambda b, g: (b, 0, 0, 0)),
        ],
        out_specs=pl.BlockSpec((None, C, p_out), lambda b, g: (b, 0, g)),
        compiler_params=pltpu.CompilerParams(
            dimension_semantics=("parallel", "parallel"),
            vmem_limit_bytes=vmem_limit),
    )(idx8, match4)


def reduced_ransac_sample(match, mask, *, check_num, ratio=0.2, key=None):
    """JAX/Pallas equivalent of reduced_ransac.forward up to (and excluding) the
    host-side cv2.findFundamentalMat call.  Returns check_match (B, 4, check_num)."""
    B, C, H, W = match.shape
    assert C == 4 and mask.shape == (B, 1, H, W)
    N = H * W

    m = match.reshape(B, 4, N).astype(jnp.float32)
    msk = mask.reshape(B, N).astype(jnp.float32)

    # ---- top_ratio_sample: top-k scores / indices of the mask (XLA glue) ----
    k = int(ratio * N)
    scores, top_idx = jax.lax.top_k(msk, k)       # fast path assumes scores > 0

    # ---- robust_rand_sample (fast path): one randint draw shared across the
    # batch, matching torch.randint(0, n, [num]). ----
    # TODO(synk): the data-dependent fallback branch (variable `num`, per-batch
    # nonzero gather) needs dynamic shapes and is not implemented.
    if key is None:
        key = jax.random.PRNGKey(0)
    rand_int = jax.random.randint(key, (check_num,), 0, k)

    # Fuse the two gathers: final column = topk_idx[b, rand_int[j]].
    final_idx = jnp.take(top_idx, rand_int, axis=1).astype(jnp.int32)   # (B, check_num)

    # ---- lane-dense layout + (8,128)-friendly padding for the Pallas gather ----
    N_pad = ((N + 127) // 128) * 128
    if N_pad != N:
        m = jnp.pad(m, ((0, 0), (0, 0), (0, N_pad - N)))
    R = N_pad // 128
    match4 = m.reshape(B, 4, R, 128)

    K_pad = ((check_num + 127) // 128) * 128
    p_out = next(c for c in (512, 256, 128) if K_pad % c == 0)   # wide output tiles
    idx_pad = jnp.pad(final_idx, ((0, 0), (0, K_pad - check_num)))
    idx8 = jnp.broadcast_to(idx_pad[:, None, :], (B, 8, K_pad))  # sublane-full block

    gathered = _gather_columns(idx8, match4, p_out)              # (B, 4, K_pad)
    return gathered[:, :, :check_num]                            # (B, 4, check_num)


def _reference(match, mask, *, check_num, ratio=0.2, key=None):
    """Pure-JAX mirror of the PyTorch ops: topk -> gather -> randint -> gather."""
    B, C, H, W = match.shape
    N = H * W
    m = match.reshape(B, 4, N).astype(jnp.float32)
    msk = mask.reshape(B, N).astype(jnp.float32)

    k = int(ratio * N)
    _, top_idx = jax.lax.top_k(msk, k)
    top_match = jnp.take_along_axis(m, top_idx[:, None, :], axis=2)      # (B, 4, k)

    if key is None:
        key = jax.random.PRNGKey(0)
    rand_int = jax.random.randint(key, (check_num,), 0, k)
    return top_match[:, :, rand_int]


if __name__ == "__main__":
    B, H, W = 2, 16, 16
    check_num = 20

    root = jax.random.PRNGKey(0)
    k_match, k_mask, k_sample = jax.random.split(root, 3)

    # Flow-style correspondences (B, 4, H, W) and a strictly positive score mask
    # (so robust_rand_sample takes the fast, static-shape branch).
    match = jax.random.normal(k_match, (B, 4, H, W), dtype=jnp.float32) * 4.0
    mask = jax.random.uniform(k_mask, (B, 1, H, W), dtype=jnp.float32,
                              minval=0.05, maxval=1.0)

    out = reduced_ransac_sample(match, mask, check_num=check_num, key=k_sample)
    out = jax.block_until_ready(out)

    ref = _reference(match, mask, check_num=check_num, key=k_sample)
    assert out.shape == (B, 4, check_num), out.shape
    assert jnp.allclose(out, ref, rtol=0.0, atol=1e-6), "mismatch vs reference"

    print("KERNEL_OK")
</pallas_src>

<mosaic_0001>
module attributes {stable_mosaic.version = 11 : i64} {
  func.func @_gather_cols_kernel(%arg0: i32, %arg1: i32, %arg2: memref<1x8x128xi32, #tpu.memory_space<vmem>>, %arg3: memref<1x4x2x128xf32, #tpu.memory_space<vmem>>, %arg4: memref<1x4x128xf32, #tpu.memory_space<vmem>>) attributes {dimension_semantics = [#tpu.dimension_semantics<parallel>, #tpu.dimension_semantics<parallel>], iteration_bounds = array<i64: 2, 1>, scalar_prefetch = 0 : i64, scratch_operands = 0 : i64, tpu.core_type = #tpu.core_type<tc>, window_params = [{transform_indices = @transform_0, window_bounds = array<i64: 1, 8, 128>}, {transform_indices = @transform_1, window_bounds = array<i64: 1, 4, 2, 128>}, {transform_indices = @transform_2, window_bounds = array<i64: 1, 4, 128>}]} {
    %0 = tpu.iota {dimensions = array<i32: 0>} : vector<128x128xi32>
    %c0 = arith.constant 0 : index
    %c0_0 = arith.constant 0 : index
    %c0_1 = arith.constant 0 : index
    %1 = vector.load %arg2[%c0, %c0_0, %c0_1] : memref<1x8x128xi32, #tpu.memory_space<vmem>>, vector<1x1x128xi32>
    %2 = vector.shape_cast %1 : vector<1x1x128xi32> to vector<1x128xi32>
    %cst = arith.constant 0.000000e+00 : f32
    %3 = vector.broadcast %cst : f32 to vector<4x128xf32>
    %c0_2 = arith.constant 0 : index
    %c0_3 = arith.constant 0 : index
    %c0_4 = arith.constant 0 : index
    %c0_5 = arith.constant 0 : index
    %4 = vector.load %arg3[%c0_2, %c0_3, %c0_4, %c0_5] : memref<1x4x2x128xf32, #tpu.memory_space<vmem>>, vector<1x4x1x128xf32>
    %5 = vector.shape_cast %4 : vector<1x4x1x128xf32> to vector<4x128xf32>
    %c0_i32 = arith.constant 0 : i32
    %6 = vector.broadcast %c0_i32 : i32 to vector<1x128xi32>
    %7 = arith.subi %2, %6 : vector<1x128xi32>
    %8 = vector.broadcast %7 : vector<1x128xi32> to vector<128x128xi32>
    %9 = arith.cmpi eq, %8, %0 : vector<128x128xi32>
    %cst_6 = arith.constant 1.000000e+00 : f32
    %cst_7 = arith.constant 0.000000e+00 : f32
    %10 = vector.broadcast %cst_6 : f32 to vector<128x128xf32>
    %11 = vector.broadcast %cst_7 : f32 to vector<128x128xf32>
    %12 = arith.select %9, %10, %11 : vector<128x128xi1>, vector<128x128xf32>
    %cst_8 = arith.constant dense<0.000000e+00> : vector<4x128xf32>
    %13 = tpu.matmul %5, %12, %cst_8 {dimension_numbers = #tpu.dot_dimension_numbers<[1], [0], [0], [1], [0, 0, 1, 1], [], []>} : vector<4x128xf32>, vector<128x128xf32>, vector<4x128xf32> -> vector<4x128xf32>
    %14 = arith.addf %3, %13 : vector<4x128xf32>
    %c0_9 = arith.constant 0 : index
    %c0_10 = arith.constant 0 : index
    %c1 = arith.constant 1 : index
    %c0_11 = arith.constant 0 : index
    %15 = vector.load %arg3[%c0_9, %c0_10, %c1, %c0_11] : memref<1x4x2x128xf32, #tpu.memory_space<vmem>>, vector<1x4x1x128xf32>
    %16 = vector.shape_cast %15 : vector<1x4x1x128xf32> to vector<4x128xf32>
    %c128_i32 = arith.constant 128 : i32
    %17 = vector.broadcast %c128_i32 : i32 to vector<1x128xi32>
    %18 = arith.subi %2, %17 : vector<1x128xi32>
    %19 = vector.broadcast %18 : vector<1x128xi32> to vector<128x128xi32>
    %20 = arith.cmpi eq, %19, %0 : vector<128x128xi32>
    %cst_12 = arith.constant 1.000000e+00 : f32
    %cst_13 = arith.constant 0.000000e+00 : f32
    %21 = vector.broadcast %cst_12 : f32 to vector<128x128xf32>
    %22 = vector.broadcast %cst_13 : f32 to vector<128x128xf32>
    %23 = arith.select %20, %21, %22 : vector<128x128xi1>, vector<128x128xf32>
    %cst_14 = arith.constant dense<0.000000e+00> : vector<4x128xf32>
    %24 = tpu.matmul %16, %23, %cst_14 {dimension_numbers = #tpu.dot_dimension_numbers<[1], [0], [0], [1], [0, 0, 1, 1], [], []>} : vector<4x128xf32>, vector<128x128xf32>, vector<4x128xf32> -> vector<4x128xf32>
    %25 = arith.addf %14, %24 : vector<4x128xf32>
    %c0_15 = arith.constant 0 : index
    %c0_16 = arith.constant 0 : index
    %c0_17 = arith.constant 0 : index
    %26 = vector.load %arg4[%c0_15, %c0_16, %c0_17] : memref<1x4x128xf32, #tpu.memory_space<vmem>>, vector<1x4x128xf32>
    %27 = vector.shape_cast %26 : vector<1x4x128xf32> to vector<4x128xf32>
    %28 = vector.shape_cast %25 : vector<4x128xf32> to vector<1x4x128xf32>
    tpu.vector_store %arg4[%c0_15, %c0_16, %c0_17], %28 {strides = array<i32>} : memref<1x4x128xf32, #tpu.memory_space<vmem>>, vector<1x4x128xf32>,
    return
  }
  func.func @transform_0(%arg0: i32, %arg1: i32) -> (i32, i32, i32) {
    %c0_i32 = arith.constant 0 : i32
    %c0_i32_0 = arith.constant 0 : i32
    return %arg0, %c0_i32, %arg1 : i32, i32, i32
  }
  func.func @transform_1(%arg0: i32, %arg1: i32) -> (i32, i32, i32, i32) {
    %c0_i32 = arith.constant 0 : i32
    %c0_i32_0 = arith.constant 0 : i32
    %c0_i32_1 = arith.constant 0 : i32
    %c0_i32_2 = arith.constant 0 : i32
    return %arg0, %c0_i32, %c0_i32_0, %c0_i32_1 : i32, i32, i32, i32
  }
  func.func @transform_2(%arg0: i32, %arg1: i32) -> (i32, i32, i32) {
    %c0_i32 = arith.constant 0 : i32
    %c0_i32_0 = arith.constant 0 : i32
    return %arg0, %c0_i32, %arg1 : i32, i32, i32
  }
}

</mosaic_0001>

<bundles_post_ra>
// kernel: tpu_custom_call.1
= control target key start
LH: loop header
LB: loop body
LE: loop exit
PB: predicated region body
PF: predicated region fallthrough
CT: control target
= control target key end

     0   :  { %7 = vsyncpa [#allocation3], 0  ;;  %s1375_s0 = inlined_call_operand.hbm [shape: s32[2,8,128], index: 0, kind: input, shape index: {}]   ;;  %s1376_s1 = inlined_call_operand.hbm [shape: f32[2,4,2,128], index: 1, kind: input, shape index: {}]   ;;  %s1377_s2 = inlined_call_operand.hbm [shape: f32[2,4,128], index: 2, kind: output, shape index: {}]  }
   0x1   :  { %9 = vsyncpa [#allocation3 + $0x1], 0 }
   0x2   :  { %10 = vsyncpa [#allocation6], 0 }
   0x3   :  { %12 = vsyncpa [#allocation6 + $0x1], 0 }
   0x4   :  { %13 = vsyncpa [#allocation4], 0 }
   0x5   :  { %15 = vsyncpa [#allocation4 + $0x1], 0  ;;  %s1048_s9 = smov 0   ;;  %s1050_s10 = smov 0  }
   0x6   :  { %s1052_s11 = smov 0   ;;  %s1054_s12 = smov 0  }
   0x7   :  { %s1056_s13 = smov 0   ;;  %s1058_s14 = smov 0  }
   0x8 LB: > { %s599_s15 = sadd.s32 4294967295, %s1022_s14   ;;  %s600_s16 = sadd.s32 4294967294, %s1022_s14   ;;  %s1022_s14 = sphi %s1058_s14, %s21_s14   ;;  %s1018_s13 = sphi %s1056_s13, %s1394_s13   ;;  %s1014_s12 = sphi %s1054_s12, %s1393_s12   ;;  %s1010_s11 = sphi %s1052_s11, %s1392_s11   ;;  %s1006_s10 = sphi %s1050_s10, %s1391_s10   ;;  %s1002_s9 = sphi %s1048_s9, %s1390_s9  }
   0x9   : > { %s33_s17 = sadd.s32 1, %s1018_s13  ;;  %s42_s18 = sadd.s32 1, %s1010_s11 }
   0xa   : > { %p35_p0 = scmp.ge.s32.totalorder %s33_s17, 2  ;;  %p49_p1 = scmp.ne.s32.totalorder %s1010_s11, %s1006_s10 }
   0xb   : > { %p50_p2 = scmp.eq.s32.totalorder %s1022_s14, 0  ;;  %p55_p3 = scmp.ne.s32.totalorder %s1006_s10, %s1002_s9 }
   0xc   : > { %s1396_s17 = smov (%p35_p0, %s33_s17), 0  ;;  %p56_p5 = scmp.eq.s32.totalorder %s599_s15, 0 }
   0xd   : > { %p1089_p4 = por %p50_p2, %p49_p1  ;;  %s37_s20 = ssub.s32 %s1018_s13, %s1396_s17 }
   0xe   : > { %p107_p6 = scmp.eq.s32.totalorder %s599_s15, 1  ;;  %p40_p7 = scmp.eq.s32.totalorder %s37_s20, 0 }
   0xf   : > { %p1095_p8 = por %p56_p5, %p55_p3  ;;  %p113_p10 = scmp.eq.s32.totalorder %s600_s16, 1 }
  0x10   : > { %p1099_p9 = por %p107_p6, %p49_p1  ;;  %p820_p13 = scmp.lt.s32.totalorder %s1022_s14, 2 }
  0x11   : > { %s1381_s21 = scalar_select %p1095_p8, 1, 0 }
  0x12   : > { %s1382_s22 = scalar_select %p1099_p9, 1, 0 }
  0x13   : > { %s1104_s23 = scalar_select %p40_p7, %s1010_s11, %s42_s18  }
  0x14   : > { %p1106_p11 = por %p113_p10, %p55_p3  ;;  %s1113_s25 = sand.u32 1, %s1010_s11  }
  0x15   : > { %s603_s26 = sshll.u32 %s1113_s25, 3  ;;  %s604_s27 = sshll.u32 %s1018_s13, 7 }
  0x16   : > { %s1383_s24 = scalar_select %p1106_p11, 1, 0 }
  0x17   : > { %s1120_s30 = scalar_lea.hbm %s1375_s0, %s604_s27  ;;  %s137_s3 = scalar_lea.vmem [#allocation2], %s603_s26 }
  0x18   : > { %s145_s4 = sshll.u32 %s137_s3, 4  ;;  %p1128_p0 = pnand %p820_p13, %p1089_p4  ;;  %s1124_s4 = int_to_ptr.vmem [resolvable:$true] %s145_s4 }
  0x19   : > { %s1135_s8 = scalar_lea.hbm %s1376_s1, %s604_s27  ;;  %s134_s15 = scalar_lea.sflag [#allocation3], %s1113_s25 }
  0x1a   : > { %s876_s16 = scalar_lea.hbm %s1120_s30, 128  ;;  %p878_p2 = pneg %p1128_p0 }
  0x1b   : > { %p877_p1 = scmp.ne.s32.totalorder %s1120_s30, %s876_s16  ;;  %s881_s20 = scalar_lea.hbm %s1375_s0, 256 }
  0x1c   : > { %p882_p4 = scmp.lt.u32.totalorder %s1120_s30, %s1375_s0  ;;  %p883_p6 = scmp.lt.u32.totalorder %s881_s20, %s876_s16 }
  0x1d   : > { %p879_p3 = pnand %p878_p2, %p877_p1  ;;  %p885_p10 = scmp.lt.u32.totalorder %s876_s16, %s1120_s30 }
  0x1e   : > { %p884_p7 = por %p883_p6, %p882_p4 }
  0x1f   : > { %p880_p5 = pneg %p879_p3 }
  0x20   : > { %p886_p13 = por %p885_p10, %p884_p7 }
  0x22   : > { %p887_p12 = pnand %p886_p13, %p880_p5 }
  0x24   : > { %890 = shalt.err (!%p887_p12)
}
  0x25   : > { %s891_s27 = scalar_lea.vmem %s1124_s4, 128  ;;  %s1024_s3 = smov [#allocation2]  }
  0x26   : > { %p892_p1 = scmp.ne.s32.totalorder %s1124_s4, %s891_s27  ;;  %s896_s6 = sshll.u32 %s1024_s3, 4  ;;  %s897_s6 = int_to_ptr.vmem [resolvable:$false] %s896_s6 }
  0x27   : > { %s898_s7 = scalar_lea.vmem %s897_s6, 256  ;;  %p899_p9 = scmp.lt.s32.totalorder %s1124_s4, %s897_s6 }
  0x28   : > { %p894_p3 = pnand %p892_p1, %p878_p2  ;;  %p900_p4 = scmp.lt.s32.totalorder %s898_s7, %s891_s27 }
  0x2a   : > { %p895_p11 = pneg %p894_p3  ;;  %p901_p6 = por %p900_p4, %p899_p9 }
  0x2c   : > { %p902_p7 = pnand %p901_p6, %p895_p11 }
  0x2e   : > { %905 = shalt.err (!%p902_p7)
}
  0x2f   : > { %812 = dma.hbm_to_vmem [thread:$0]  (!%p1128_p0), %s1120_s30, 128, %s1124_s4, %s134_s15  }
  0x30   : > { %s156_s16 = scalar_lea.vmem [#allocation5], %s603_s26  ;;  %p608_p9 = scmp.ge.s32.totalorder %s1022_s14, 1 }
  0x31   : > { %s163_s18 = sshll.u32 %s156_s16, 4  ;;  %p171_p11 = scmp.lt.s32.totalorder %s1022_s14, 3  ;;  %s1166_s18 = int_to_ptr.vmem [resolvable:$true] %s163_s18 }
  0x32   : > { %s153_s20 = scalar_lea.sflag [#allocation6], %s1113_s25  ;;  %s906_s28 = scalar_lea.hbm %s1135_s8, 128 }
  0x33   : > { %p1169_p12 = pnand %p608_p9, %p171_p11  ;;  %p907_p5 = scmp.ne.s32.totalorder %s1135_s8, %s906_s28 }
  0x34   : > { %s911_s26 = scalar_lea.hbm %s1376_s1, 256  ;;  %p912_p1 = scmp.lt.u32.totalorder %s1135_s8, %s1376_s1 }
  0x35   : > { %p909_p10 = pnand %p907_p5, %p878_p2  ;;  %p913_p3 = scmp.lt.u32.totalorder %s911_s26, %s906_s28 }
  0x36   : > { %p915_p6 = scmp.lt.u32.totalorder %s906_s28, %s1135_s8 }
  0x37   : > { %p910_p13 = pneg %p909_p10  ;;  %p914_p4 = por %p913_p3, %p912_p1 }
  0x39   : > { %p916_p7 = por %p915_p6, %p914_p4 }
  0x3b   : > { %p917_p9 = pnand %p916_p7, %p910_p13 }
  0x3d   : > { %920 = shalt.err (!%p917_p9)
}
  0x3e   : > { %s921_s27 = scalar_lea.vmem %s1166_s18, 128  ;;  %s1025_s3 = smov [#allocation5]  }
  0x3f   : > { %p922_p11 = scmp.ne.s32.totalorder %s1166_s18, %s921_s27  ;;  %s926_s6 = sshll.u32 %s1025_s3, 4  ;;  %s927_s6 = int_to_ptr.vmem [resolvable:$false] %s926_s6 }
  0x40   : > { %s928_s7 = scalar_lea.vmem %s927_s6, 256  ;;  %p929_p8 = scmp.lt.s32.totalorder %s1166_s18, %s927_s6 }
  0x41   : > { %p924_p5 = pnand %p922_p11, %p878_p2  ;;  %p930_p1 = scmp.lt.s32.totalorder %s928_s7, %s921_s27 }
  0x43   : > { %p925_p10 = pneg %p924_p5  ;;  %p931_p3 = por %p930_p1, %p929_p8 }
  0x45   : > { %p932_p4 = pnand %p931_p3, %p925_p10 }
  0x47   : > { %935 = shalt.err (!%p932_p4)
}
  0x48   : > { %s1026_s16 = smov 32   ;;  %s1027_s28 = smov 2  }
  0x49   : > { %815 = dma.hbm_to_vmem [thread:$0]  (!%p1128_p0), %s1135_s8, 128, %s1166_s18, %s153_s20, %s1026_s16, %s1026_s16, %s1027_s28  }
  0x4a   : > { %175 = sbr.rel (%p1169_p12) target bundleno = 355 (0x163), region = 28  ;;  %s1202_s30 = sand.u32 (!%p1169_p12), 1, %s1006_s10  }
  0x4b   : > { %s609_s4 = sshll.u32 (!%p1169_p12), %s1202_s30, 3  ;;  %s178_s26 = scalar_lea.sflag (!%p1169_p12), [#allocation3], %s1202_s30 }
  0x4c   : > { %s181_s15 = scalar_lea.vmem (!%p1169_p12), [#allocation2], %s609_s4  ;;  %p1386_p8 = scmp.ne.s32.totalorder (!%p1169_p12), %s1381_s21, 0 }
  0x51   : > { %989 = dma.done.wait (%p1386_p8), %s178_s26, 128  }
  0x52   : > { %991 = vsyncadd (%p1386_p8), %s178_s26, 4294967168  ;;  %s187_s25 = scalar_lea.sflag [#allocation6], %s1202_s30  ;;  %s1211_s5 = scalar_lea.vmem [#allocation5], %s609_s4 }
  0x53   : > { %993 = dma.done.wait (%p1386_p8), %s187_s25, 128  }
  0x54   : > { %995 = vsyncadd (%p1386_p8), %s187_s25, 4294967168  ;;  %v216_v0 = vlaneseq  ;;  %v1028_v1 = vmov 0.0|0.0   ;;  %vm1029_vm0 = vmmov 0   ;;  %v1030_v3 = vmov 0.0   ;;  %v233_v7 = vld [vmem:[%s181_s15] sm:$0x1] }
  0x55   : > { %778 = vmatprep.subr.bf16.mxu0 %v1028_v1  ;;  %754 = vmatprep.subr.bf16.mxu1 %v1028_v1  ;;  %v612_v10 = vadd.s32 4294967168, %v233_v7  ;;  %v1031_v14 = vmov 1.0|1.0   ;;  %v235_v23 = vld [vmem:[%s1211_s5 + $0x2] sm:$0x1]  ;;  %s611_s21 = sshll.u32 %s1202_s30, 2 }
  0x56   : > { %v1219_v2 = vshrl.u32 %v216_v0, 7  ;;  %751 = vmatprep.mubr.msk.f32.mxu0 %vm1029_vm0, %v1030_v3  ;;  %716 = vmatprep.mubr.msk.f32.mxu1 %vm1029_vm0, %v1030_v3  ;;  %v275_v25 = vld [vmem:[%s1211_s5 + $0x3] sm:$0x1]  ;;  %v236_v27 = vld [vmem:[%s1211_s5 + $0x4] sm:$0x1]  ;;  %v403_v28 = vrot.slane %v235_v23, 7 }
  0x57   : > { %v234_v29 = vld [vmem:[%s1211_s5] sm:$0x1]  ;;  %v276_v30 = vld [vmem:[%s1211_s5 + $0x5] sm:$0x1]  ;;  %v319_v31 = vrot.slane %v275_v25, 7  ;;  %v405_v33 = vrot.slane %v236_v27, 6 }
  0x58   : > { %v240_v4 = vsub.s32 0, %v1219_v2  ;;  %v218_v5 = vadd.s32 8, %v1219_v2  ;;  %v219_v6 = vadd.s32 16, %v1219_v2  ;;  %v220_v8 = vadd.s32 24, %v1219_v2  ;;  %v237_v32 = vld [vmem:[%s1211_s5 + $0x6] sm:$0x1] }
  0x59   : > { %v221_v11 = vadd.s32 32, %v1219_v2  ;;  %v222_v12 = vadd.s32 40, %v1219_v2  ;;  %v223_v15 = vadd.s32 48, %v1219_v2  ;;  %v224_v16 = vadd.s32 56, %v1219_v2  ;;  %v274_v34 = vld [vmem:[%s1211_s5 + $0x1] sm:$0x1] }
  0x5a   : > { %v1225_v9 = vrot.slane %v233_v7, %v240_v4  ;;  %v1232_v13 = vrot.slane %v612_v10, %v240_v4  ;;  %v225_v17 = vadd.s32 64, %v1219_v2  ;;  %v226_v18 = vadd.s32 72, %v1219_v2  ;;  %v277_v36 = vld [vmem:[%s1211_s5 + $0x7] sm:$0x1]  ;;  %s646_s8 = sshll.u32 %s1014_s12, 6  ;;  %s215_s18 = scalar_lea.vmem [#allocation7], %s611_s21 }
  0x5b   : > { %v227_v19 = vadd.s32 80, %v1219_v2  ;;  %v228_v20 = vadd.s32 88, %v1219_v2  ;;  %v229_v21 = vadd.s32 96, %v1219_v2  ;;  %v230_v22 = vadd.s32 104, %v1219_v2  ;;  %s496_s19 = sshll.u32 %s215_s18, 4  ;;  %s1326_s27 = scalar_lea.hbm %s1377_s2, %s646_s8  ;;  %s1328_s19 = int_to_ptr.vmem [resolvable:$true] %s496_s19 }
  0x5c   : > { %vm242_vm1 = vcmp.eq.s32.totalorder %v1225_v9, %v1219_v2  ;;  %vm243_vm2 = vcmp.eq.s32.totalorder %v1225_v9, %v218_v5  ;;  %vm244_vm3 = vcmp.eq.s32.totalorder %v1225_v9, %v219_v6  ;;  %vm245_vm5 = vcmp.eq.s32.totalorder %v1225_v9, %v220_v8  ;;  %s482_s3 = scalar_lea.sflag [#allocation4], %s1202_s30  ;;  %s936_s6 = scalar_lea.vmem %s1328_s19, 64 }
  0x5d   : > { %vm779_vm4 = vmpackc.low %vm243_vm2, %vm242_vm1  ;;  %vm283_vm6 = vcmp.eq.s32.totalorder %v1232_v13, %v1219_v2  ;;  %vm284_vm7 = vcmp.eq.s32.totalorder %v1232_v13, %v218_v5  ;;  %vm285_vm9 = vcmp.eq.s32.totalorder %v1232_v13, %v219_v6  ;;  %vm286_vm10 = vcmp.eq.s32.totalorder %v1232_v13, %v220_v8  ;;  %p937_p0 = scmp.ne.s32.totalorder %s1328_s19, %s936_s6  ;;  %p1387_p2 = scmp.ne.s32.totalorder %s1382_s22, 0 }
  0x5e   : > { %780 = vmatpush3.bf16.msk.msra.mxu0 %vm779_vm4, %v1031_v14  ;;  %vm782_vm8 = vmpackc.low %vm245_vm5, %vm244_vm3  ;;  %vm246_vm12 = vcmp.eq.s32.totalorder %v1225_v9, %v221_v11  ;;  %vm247_vm13 = vcmp.eq.s32.totalorder %v1225_v9, %v222_v12  ;;  %vm287_vm15 = vcmp.eq.s32.totalorder %v1232_v13, %v221_v11  ;;  %vm288_vm0 = vcmp.eq.s32.totalorder %v1232_v13, %v222_v12  ;;  %s1032_s12 = smov [#allocation7]  }
  0x5f   : > { %vm755_vm11 = vmpackc.low %vm284_vm7, %vm283_vm6  ;;  %781 = vmatprep.subr.bf16.mxu0 %v1028_v1  ;;  %vm248_vm2 = vcmp.eq.s32.totalorder %v1225_v9, %v223_v15  ;;  %vm249_vm3 = vcmp.eq.s32.totalorder %v1225_v9, %v224_v16  ;;  %vm289_vm5 = vcmp.eq.s32.totalorder %v1232_v13, %v223_v15  ;;  %vm290_vm6 = vcmp.eq.s32.totalorder %v1232_v13, %v224_v16  ;;  %p938_p12 = pnand %p937_p0, %p1387_p2  ;;  %s940_s7 = sshll.u32 %s1032_s12, 4  ;;  %s941_s7 = int_to_ptr.vmem [resolvable:$false] %s940_s7 }
  0x60   : > { %756 = vmatpush3.bf16.msk.msra.mxu1 %vm755_vm11, %v1031_v14  ;;  %vm758_vm14 = vmpackc.low %vm286_vm10, %vm285_vm9  ;;  %vm251_vm9 = vcmp.eq.s32.totalorder %v1225_v9, %v226_v18  ;;  %vm291_vm11 = vcmp.eq.s32.totalorder %v1232_v13, %v225_v17  ;;  %v231_v24 = vadd.s32 112, %v1219_v2  ;;  %v232_v26 = vadd.s32 120, %v1219_v2  ;;  %s942_s16 = scalar_lea.vmem %s941_s7, 128  ;;  %p943_p6 = scmp.lt.s32.totalorder %s1328_s19, %s941_s7 }
  0x61   : > { %757 = vmatprep.subr.bf16.mxu1 %v1028_v1  ;;  %vm785_vm1 = vmpackc.low %vm247_vm13, %vm246_vm12  ;;  %vm292_vm12 = vcmp.eq.s32.totalorder %v1232_v13, %v226_v18  ;;  %v322_v37 = vrot.slane %v276_v30, 6  ;;  %v407_v38 = vrot.slane %v237_v32, 5  ;;  %v325_v41 = vrot.slane %v277_v36, 5  ;;  %p939_p13 = pneg %p938_p12  ;;  %p944_p7 = scmp.lt.s32.totalorder %s942_s16, %s936_s6 }
  0x62   : > { %783 = vmatpush3.bf16.msk.msra.mxu0 %vm782_vm8, %v1031_v14  ;;  %vm761_vm4 = vmpackc.low %vm288_vm0, %vm287_vm15  ;;  %vm250_vm8 = vcmp.eq.s32.totalorder %v1225_v9, %v225_v17  ;;  %vm253_vm15 = vcmp.eq.s32.totalorder %v1225_v9, %v228_v20 }
  0x63   : > { %784 = vmatprep.subr.bf16.mxu0 %v1028_v1  ;;  %vm788_vm7 = vmpackc.low %vm249_vm3, %vm248_vm2  ;;  %vm294_vm2 = vcmp.eq.s32.totalorder %v1232_v13, %v228_v20  ;;  %p945_p9 = por %p944_p7, %p943_p6 }
  0x64   : > { %759 = vmatpush3.bf16.msk.msra.mxu1 %vm758_vm14, %v1031_v14  ;;  %vm764_vm10 = vmpackc.low %vm290_vm6, %vm289_vm5  ;;  %vm252_vm14 = vcmp.eq.s32.totalorder %v1225_v9, %v227_v19  ;;  %vm255_vm5 = vcmp.eq.s32.totalorder %v1225_v9, %v230_v22 }
  0x65   : > { %760 = vmatprep.subr.bf16.mxu1 %v1028_v1  ;;  %vm791_vm13 = vmpackc.low %vm251_vm9, %vm250_vm8  ;;  %vm295_vm8 = vcmp.eq.s32.totalorder %v1232_v13, %v229_v21  ;;  %vm296_vm9 = vcmp.eq.s32.totalorder %v1232_v13, %v230_v22  ;;  %p946_p11 = pnand %p945_p9, %p939_p13 }
  0x66   : > { %786 = vmatpush3.bf16.msk.msra.mxu0 %vm785_vm1, %v1031_v14  ;;  %vm767_vm0 = vmpackc.low %vm292_vm12, %vm291_vm11  ;;  %vm293_vm1 = vcmp.eq.s32.totalorder %v1232_v13, %v227_v19  ;;  %vm256_vm11 = vcmp.eq.s32.totalorder %v1225_v9, %v231_v24  ;;  %vm257_vm12 = vcmp.eq.s32.totalorder %v1225_v9, %v232_v26 }
  0x67   : > { %787 = vmatprep.subr.bf16.mxu0 %v1028_v1  ;;  %vm794_vm3 = vmpackc.low %vm253_vm15, %vm252_vm14  ;;  %vm297_vm15 = vcmp.eq.s32.totalorder %v1232_v13, %v231_v24 }
  0x68   : > { %762 = vmatpush3.bf16.msk.msra.mxu1 %vm761_vm4, %v1031_v14  ;;  %vm254_vm4 = vcmp.eq.s32.totalorder %v1225_v9, %v229_v21  ;;  %vm770_vm6 = vmpackc.low %vm294_vm2, %vm293_vm1  ;;  %vm326_vm2 = vcmask 1043459  }
  0x69   : > { %763 = vmatprep.subr.bf16.mxu1 %v1028_v1  ;;  %vm773_vm14 = vmpackc.low %vm296_vm9, %vm295_vm8 }
  0x6a   : > { %789 = vmatpush3.bf16.msk.msra.mxu0 %vm788_vm7, %v1031_v14  ;;  %vm320_vm7 = vcmask 1041409   ;;  %vm800_vm1 = vmpackc.low %vm257_vm12, %vm256_vm11 }
  0x6b   : > { %790 = vmatprep.subr.bf16.mxu0 %v1028_v1  ;;  %v404_v35 = vsel %vm320_vm7, %v403_v28, %v234_v29  ;;  %v321_v39 = vsel %vm320_vm7, %v319_v31, %v274_v34 }
  0x6c   : > { %765 = vmatpush3.bf16.msk.msra.mxu1 %vm764_vm10, %v1031_v14  ;;  %vm797_vm10 = vmpackc.low %vm255_vm5, %vm254_vm4 }
  0x6d   : > { %766 = vmatprep.subr.bf16.mxu1 %v1028_v1 }
  0x6e   : > { %792 = vmatpush3.bf16.msk.msra.mxu0 %vm791_vm13, %v1031_v14  ;;  %vm323_vm13 = vcmask 1042434  }
  0x6f   : > { %793 = vmatprep.subr.bf16.mxu0 %v1028_v1  ;;  %v406_v40 = vsel %vm323_vm13, %v405_v33, %v404_v35  ;;  %v324_v42 = vsel %vm323_vm13, %v322_v37, %v321_v39 }
  0x70   : > { %768 = vmatpush3.bf16.msk.msra.mxu1 %vm767_vm0, %v1031_v14  ;;  %vm298_vm0 = vcmp.eq.s32.totalorder %v1232_v13, %v232_v26  ;;  %v408_v43 = vsel %vm326_vm2, %v407_v38, %v406_v40  ;;  %v327_v44 = vsel %vm326_vm2, %v325_v41, %v324_v42 }
  0x71   : > { %769 = vmatprep.subr.bf16.mxu1 %v1028_v1 }
  0x72   : > { %795 = vmatpush3.bf16.msk.msra.mxu0 %vm794_vm3, %v1031_v14  ;;  %vm776_vm3 = vmpackc.low %vm298_vm0, %vm297_vm15 }
  0x73   : > { %796 = vmatprep.subr.bf16.mxu0 %v1028_v1 }
  0x74   : > { %771 = vmatpush3.bf16.msk.msra.mxu1 %vm770_vm6, %v1031_v14 }
  0x75   : > { %772 = vmatprep.subr.bf16.mxu1 %v1028_v1 }
  0x76   : > { %798 = vmatpush3.bf16.msk.msra.mxu0 %vm797_vm10, %v1031_v14 }
  0x77   : > { %799 = vmatprep.subr.bf16.mxu0 %v1028_v1 }
  0x78   : > { %774 = vmatpush3.bf16.msk.msra.mxu1 %vm773_vm14, %v1031_v14 }
  0x79   : > { %775 = vmatprep.subr.bf16.mxu1 %v1028_v1 }
  0x7a   : > { %801 = vmatpush3.bf16.msk.msra.mxu0 %vm800_vm1, %v1031_v14 }
  0x7c   : > { %777 = vmatpush3.bf16.msk.msra.mxu1 %vm776_vm3, %v1031_v14 }
  0x7d   : > { %752 = vmatmul.mubr.f32.vlgmr.msra.gmra.mrb[0].mxu0 %v408_v43 }
  0x7f   : > { %717 = vmatmul.mubr.f32.vlgmr.msra.gmra.mrb[0].mxu1 %v327_v44 }
 0x150   : > { %v476_v45 = vpop.f32.mrb[0].mxu0 }
 0x151   : > { %v753_v46 = vpop.f32.mrb[1].mxu0 }
 0x152   : > { %v395_v47 = vpop.f32.mrb[0].mxu1 }
 0x153   : > { %v477_v48 = vadd.f32 %v476_v45, %v395_v47  ;;  %v718_v49 = vpop.f32.mrb[1].mxu1 }
 0x155   : > { %480 = vst [vmem:[%s215_s18] sm:$0xf] %v477_v48 }
 0x156   : > { %949 = shalt.err (!%p946_p11)
}
 0x157   : > { %s950_s28 = scalar_lea.hbm %s1326_s27, 64  ;;  %s954_s26 = scalar_lea.hbm %s1377_s2, 128 }
 0x158   : > { %p951_p5 = scmp.ne.s32.totalorder %s1326_s27, %s950_s28  ;;  %p955_p3 = scmp.lt.u32.totalorder %s1326_s27, %s1377_s2 }
 0x159   : > { %p956_p4 = scmp.lt.u32.totalorder %s954_s26, %s950_s28  ;;  %p958_p0 = scmp.lt.u32.totalorder %s950_s28, %s1326_s27 }
 0x15a   : > { %p952_p10 = pnand %p951_p5, %p1387_p2 }
 0x15b   : > { %p957_p8 = por %p956_p4, %p955_p3 }
 0x15c   : > { %p953_p1 = pneg %p952_p10 }
 0x15d   : > { %p959_p12 = por %p958_p0, %p957_p8 }
 0x15f   : > { %p960_p13 = pnand %p959_p12, %p953_p1 }
 0x161   : > { %963 = shalt.err (!%p960_p13)
}
 0x162   : > { %807 = dma.vmem_to_hbm [thread:$0]  (%p1387_p2), %s1328_s19, 64, %s1326_s27, %s482_s3  }
 0x163 PF: > { %s508_s5 = sand.u32 1, %s1002_s9   ;;  %p1388_p6 = scmp.ne.s32.totalorder %s1383_s24, 0 }
 0x164   : > { %p1389_p7 = scmp.ge.s32.totalorder %s1022_s14, 2  ;;  %s509_s21 = scalar_lea.sflag [#allocation4], %s508_s5 }
 0x166   : > { %p817_p9 = pnand %p1389_p7, %p1388_p6 }
 0x168   : > { %997 = dma.done.wait (!%p817_p9), %s509_s21, 64  }
 0x169   : > { %999 = vsyncadd (!%p817_p9), %s509_s21, 4294967232  ;;  %s21_s14 = sadd.s32 1, %s1022_s14   ;;  %s1390_s9 = smov %s1006_s10 }
 0x16a   : > { %p18_p11 = scmp.ge.s32.totalorder %s21_s14, 4   ;;  %s1391_s10 = smov %s1010_s11 }
 0x16b   : > { %s1392_s11 = smov %s1104_s23  ;;  %s1393_s12 = smov %s1018_s13 }
 0x16c   : > { %s1394_s13 = smov %s1396_s17  ;;  %20 = sbr.rel (!%p18_p11) target bundleno = 8 (0x8), region = 86 }
 0x173   :  { %514 = vsyncpa [#allocation3], 1 }
 0x174   :  { %516 = vsyncpa [#allocation3 + $0x1], 1 }
 0x175   :  { %517 = vsyncpa [#allocation6], 1 }
 0x176   :  { %519 = vsyncpa [#allocation6 + $0x1], 1 }
 0x177   :  { %520 = vsyncpa [#allocation4], 1 }
 0x178   :  { %522 = vsyncpa [#allocation4 + $0x1], 1 }

</bundles_post_ra>
